<compile_context>
chip_gen: v6e
topology: v6e:2x2x1
jax: 0.10.0
libtpu: 0.0.40
codegen_flags: <defaults>
</compile_context>

<pallas_src>
import functools

import jax
import jax.numpy as jnp
from jax.experimental import pallas as pl
from jax.experimental.pallas import tpu as pltpu


def _round_up(v, m):
    return ((v + m - 1) // m) * m


def _pim_resident_kernel(x_ref, w_ref, o_ref, *, temp):
    # x_ref: (tm, F_pad), w_ref: (F_pad, tn)  ->  o_ref: (tm, tn)
    o_ref[...] = (
        jnp.dot(x_ref[...], w_ref[...], preferred_element_type=jnp.float32) * temp
    ).astype(o_ref.dtype)


def _pim_ktiled_kernel(x_ref, w_ref, o_ref, *, temp):
    # Grid (i, j, k); the output index_map ignores k, so o_ref (f32) stays
    # resident across the K reduction -> accumulate directly into it.
    k = pl.program_id(2)

    @pl.when(k == 0)
    def _():
        o_ref[...] = jnp.zeros_like(o_ref)

    o_ref[...] += jnp.dot(
        x_ref[...], w_ref[...], preferred_element_type=jnp.float32
    ).astype(o_ref.dtype)

    @pl.when(k == pl.num_programs(2) - 1)
    def _():
        o_ref[...] = o_ref[...] * temp


def prepare_pim_weight(weight, *, cast_bf16=False):
    """One-time parameter setup (do NOT call per forward).

    Takes the nn.Linear weight in PyTorch (num_classes, num_features) layout and
    returns it transposed to (F, C) and zero-padded to a lane/MXU-friendly
    (F_pad, C_pad), so the forward kernel is a plain (M,K)x(K,N) contraction
    with no per-call pad/transpose HBM traffic on the weight.
    """
    C, F = weight.shape
    F_pad = _round_up(F, 128)
    C_pad = _round_up(C, 128)
    w = weight.T  # (F, C)
    if (F_pad, C_pad) != (F, C):
        w = jnp.pad(w, ((0, F_pad - F), (0, C_pad - C)))
    if cast_bf16:
        w = w.astype(jnp.bfloat16)
    return w


def pim_partitioner(x, w_prepared, num_classes, temp, *,
                    cast_bf16=False, force_ktiled=False):
    """Forward: (x @ W.T) * temp.

    x: (B, F) float32; w_prepared: (F_pad, C_pad) from prepare_pim_weight.
    """
    B, F = x.shape
    F_pad, C_pad = w_prepared.shape
    assert F <= F_pad and num_classes <= C_pad

    temp = float(temp)  # module constant -> closed over as a Python float.

    # --- tiling --------------------------------------------------------------
    tm = min(256, _round_up(B, 8))
    B_pad = _round_up(B, tm)
    # Largest N tile that divides C_pad (C_pad is a multiple of 128).
    tn = next(c for c in (512, 256, 128) if C_pad % c == 0)
    # Note: for production batch sizes (B_pad > tm) the M axis has >= 2
    # "parallel" tiles, so v7x's second TensorCore is used.

    in_dtype = jnp.bfloat16 if cast_bf16 else x.dtype
    elem = jnp.dtype(in_dtype).itemsize

    # Resident-weight working set: x/w blocks double-buffered + f32 out blocks.
    resident_bytes = elem * (2 * tm * F_pad + 2 * F_pad * tn) + 4 * (2 * tm * tn)
    use_resident = (not force_ktiled) and resident_bytes <= 40 * 1024 * 1024

    # --- per-call input prep (weight is already padded; only x may need it) ---
    if (B_pad, F_pad) != (B, F):
        x_p = jnp.pad(x, ((0, B_pad - B), (0, F_pad - F)))
    else:
        x_p = x
    if cast_bf16:
        x_p = x_p.astype(jnp.bfloat16)
        w_in = w_prepared.astype(jnp.bfloat16)
    else:
        w_in = w_prepared

    if use_resident:
        grid = (B_pad // tm, C_pad // tn)
        kernel = functools.partial(_pim_resident_kernel, temp=temp)
        in_specs = [
            pl.BlockSpec((tm, F_pad), lambda i, j: (i, 0)),   # x tile
            pl.BlockSpec((F_pad, tn), lambda i, j: (0, j)),   # resident weight
        ]
        out_specs = pl.BlockSpec((tm, tn), lambda i, j: (i, j))
        dim_sem = ("parallel", "parallel")
        vmem_bytes = resident_bytes
    else:
        # Large-F fallback: K-tiled reduction, accumulate into resident output.
        tk = next(c for c in (2048, 1024, 512, 256, 128) if F_pad % c == 0)
        grid = (B_pad // tm, C_pad // tn, F_pad // tk)
        kernel = functools.partial(_pim_ktiled_kernel, temp=temp)
        in_specs = [
            pl.BlockSpec((tm, tk), lambda i, j, k: (i, k)),
            pl.BlockSpec((tk, tn), lambda i, j, k: (k, j)),
        ]
        out_specs = pl.BlockSpec((tm, tn), lambda i, j, k: (i, j))
        dim_sem = ("parallel", "parallel", "arbitrary")
        vmem_bytes = elem * (2 * tm * tk + 2 * tk * tn) + 4 * (2 * tm * tn)

    vmem_limit = min(48 * 1024 * 1024, max(2 * 1024 * 1024, int(vmem_bytes * 1.5)))

    out_padded = pl.pallas_call(
        kernel,
        out_shape=jax.ShapeDtypeStruct((B_pad, C_pad), jnp.float32),
        grid_spec=pltpu.PrefetchScalarGridSpec(
            num_scalar_prefetch=0,
            grid=grid,
            in_specs=in_specs,
            out_specs=out_specs,
        ),
        compiler_params=pltpu.CompilerParams(
            dimension_semantics=dim_sem,
            vmem_limit_bytes=vmem_limit,
        ),
    )(x_p, w_in)

    if (B_pad, C_pad) != (B, num_classes):
        return out_padded[:B, :num_classes]
    return out_padded


if __name__ == "__main__":
    # Small shapes consistent with the module (num_features scaled down, C=100).
    batch = 8
    num_features = 256
    num_classes = 100
    temp = 25.0

    key = jax.random.PRNGKey(0)
    kx, kw = jax.random.split(key)

    x = jax.random.normal(kx, (batch, num_features), dtype=jnp.float32)
    # Deterministic init mimicking nn.Linear default: U(-1/sqrt(F), 1/sqrt(F))
    bound = 1.0 / (num_features ** 0.5)
    weight = jax.random.uniform(
        kw, (num_classes, num_features), dtype=jnp.float32,
        minval=-bound, maxval=bound,
    )

    # One-time parameter setup (transpose + pad the weight once).
    w_prep = prepare_pim_weight(weight)

    ref = (x @ weight.T) * temp

    # Default resident-weight path.
    out = pim_partitioner(x, w_prep, num_classes, temp)
    out = jax.block_until_ready(out)
    assert out.shape == (batch, num_classes)
    assert jnp.allclose(out, ref, atol=1e-4, rtol=1e-4)

    # Also exercise the large-F (K-tiled, accumulate-into-output) fallback path.
    out_kt = pim_partitioner(x, w_prep, num_classes, temp, force_ktiled=True)
    out_kt = jax.block_until_ready(out_kt)
    assert jnp.allclose(out_kt, ref, atol=1e-4, rtol=1e-4)

    print("KERNEL_OK")
</pallas_src>

<mosaic_0001>
module attributes {stable_mosaic.version = 11 : i64} {
  func.func @_pim_resident_kernel(%arg0: i32, %arg1: i32, %arg2: memref<8x256xf32, #tpu.memory_space<vmem>>, %arg3: memref<256x128xf32, #tpu.memory_space<vmem>>, %arg4: memref<8x128xf32, #tpu.memory_space<vmem>>) attributes {dimension_semantics = [#tpu.dimension_semantics<parallel>, #tpu.dimension_semantics<parallel>], iteration_bounds = array<i64: 1, 1>, scalar_prefetch = 0 : i64, scratch_operands = 0 : i64, tpu.core_type = #tpu.core_type<tc>, window_params = [{transform_indices = @transform_0, window_bounds = array<i64: 8, 256>}, {transform_indices = @transform_1, window_bounds = array<i64: 256, 128>}, {transform_indices = @transform_2, window_bounds = array<i64: 8, 128>}]} {
    %c0 = arith.constant 0 : index
    %c0_0 = arith.constant 0 : index
    %0 = vector.load %arg2[%c0, %c0_0] : memref<8x256xf32, #tpu.memory_space<vmem>>, vector<8x256xf32>
    %c0_1 = arith.constant 0 : index
    %c0_2 = arith.constant 0 : index
    %1 = vector.load %arg3[%c0_1, %c0_2] : memref<256x128xf32, #tpu.memory_space<vmem>>, vector<256x128xf32>
    %cst = arith.constant dense<0.000000e+00> : vector<8x128xf32>
    %2 = tpu.matmul %0, %1, %cst {dimension_numbers = #tpu.dot_dimension_numbers<[1], [0], [0], [1], [0, 0, 1, 1], [], []>} : vector<8x256xf32>, vector<256x128xf32>, vector<8x128xf32> -> vector<8x128xf32>
    %cst_3 = arith.constant 2.500000e+01 : f32
    %3 = vector.broadcast %cst_3 : f32 to vector<8x128xf32>
    %4 = arith.mulf %2, %3 : vector<8x128xf32>
    %c0_4 = arith.constant 0 : index
    %c0_5 = arith.constant 0 : index
    %5 = vector.load %arg4[%c0_4, %c0_5] : memref<8x128xf32, #tpu.memory_space<vmem>>, vector<8x128xf32>
    tpu.vector_store %arg4[%c0_4, %c0_5], %4 {strides = array<i32>} : memref<8x128xf32, #tpu.memory_space<vmem>>, vector<8x128xf32>,
    return
  }
  func.func @transform_0(%arg0: i32, %arg1: i32) -> (i32, i32) {
    %c0_i32 = arith.constant 0 : i32
    %c0_i32_0 = arith.constant 0 : i32
    return %arg0, %c0_i32 : i32, i32
  }
  func.func @transform_1(%arg0: i32, %arg1: i32) -> (i32, i32) {
    %c0_i32 = arith.constant 0 : i32
    %c0_i32_0 = arith.constant 0 : i32
    return %c0_i32, %arg1 : i32, i32
  }
  func.func @transform_2(%arg0: i32, %arg1: i32) -> (i32, i32) {
    %c0_i32 = arith.constant 0 : i32
    return %arg0, %arg1 : i32, i32
  }
}

</mosaic_0001>

<bundles_post_ra>
// kernel: tpu_custom_call.1
= control target key start
LH: loop header
LB: loop body
LE: loop exit
PB: predicated region body
PF: predicated region fallthrough
CT: control target
= control target key end

     0   :  { %7 = vsyncpa [#allocation3], 0  ;;  %s295_s0 = inlined_call_operand.hbm [shape: f32[8,256], index: 0, kind: input, shape index: {}]   ;;  %s296_s1 = inlined_call_operand.hbm [shape: f32[256,128], index: 1, kind: input, shape index: {}]   ;;  %s297_s2 = inlined_call_operand.hbm [shape: f32[8,128], index: 2, kind: output, shape index: {}]  }
   0x1   :  { %8 = vsyncpa [#allocation6], 0 }
   0x2   :  { %9 = vsyncpa [#allocation4], 0  ;;  %s266_s9 = smov [#allocation2]   ;;  %s267_s11 = smov [#allocation5]  }
   0x3   :  { %s16_s10 = sshll.u32 %s266_s9, 4  ;;  %s25_s12 = sshll.u32 %s267_s11, 4  ;;  %s17_s10 = int_to_ptr.vmem [resolvable:$true] %s16_s10  ;;  %s26_s12 = int_to_ptr.vmem [resolvable:$true] %s25_s12 }
   0x4   :  { %s208_s13 = scalar_lea.vmem %s17_s10, 256  ;;  %p213_p1 = scmp.lt.s32.totalorder %s17_s10, %s17_s10 }
   0x5   :  { %p209_p0 = scmp.ne.s32.totalorder %s17_s10, %s208_s13  ;;  %p214_p2 = scmp.lt.s32.totalorder %s208_s13, %s208_s13 }
   0x7   :  { %p215_p3 = por %p214_p2, %p213_p1 }
   0x9   :  { %p216_p4 = pnand %p215_p3, %p209_p0 }
   0xb   :  { %219 = shalt.err (!%p216_p4)
}
   0xc   :  { %19 = dma.hbm_to_vmem [thread:$0]  %s295_s0, 256, %s17_s10, [#allocation3]  }
   0xd   :  { %s228_s16 = scalar_lea.vmem %s26_s12, 4096  ;;  %p233_p6 = scmp.lt.s32.totalorder %s26_s12, %s26_s12 }
   0xe   :  { %p229_p5 = scmp.ne.s32.totalorder %s26_s12, %s228_s16  ;;  %p234_p7 = scmp.lt.s32.totalorder %s228_s16, %s228_s16 }
  0x10   :  { %p235_p8 = por %p234_p7, %p233_p6 }
  0x12   :  { %p236_p9 = pnand %p235_p8, %p229_p5 }
  0x14   :  { %239 = shalt.err (!%p236_p9)
}
  0x15   :  { %s268_s17 = smov 128   ;;  %s269_s18 = smov 8  }
  0x16   :  { %31 = dma.hbm_to_vmem [thread:$0]  %s296_s1, 4096, %s26_s12, [#allocation6], %s268_s17, %s268_s17, %s269_s18  }
  0x17   :  { %260 = dma.done.wait [#allocation3], 256  }
  0x18   :  { %261 = vsyncadd [#allocation3], 4294967040 }
  0x19   :  { %262 = dma.done.wait [#allocation6], 4096  }
  0x1a   :  { %263 = vsyncadd [#allocation6], 4294963200  ;;  %v71_v0 = vld [vmem:[#allocation5 + $0xf8] sm:$0xff]  ;;  %v70_v2 = vld [vmem:[#allocation5 + $0xf0] sm:$0xff]  ;;  %s270_s0 = smov [#allocation7]  }
  0x1b   :  { %v55_v1 = vld [vmem:[#allocation5 + $0x78] sm:$0xff]  ;;  %160 = vmatprep.subr.mxu0 %v71_v0  ;;  %v54_v3 = vld [vmem:[#allocation5 + $0x70] sm:$0xff]  ;;  %v69_v4 = vld [vmem:[#allocation5 + $0xe8] sm:$0xff]  ;;  %s150_s1 = sshll.u32 %s270_s0, 4  ;;  %s151_s1 = int_to_ptr.vmem [resolvable:$true] %s150_s1 }
  0x1c   :  { %161 = vmatpush3.msra.mxu0 %v55_v1  ;;  %v53_v5 = vld [vmem:[#allocation5 + $0x68] sm:$0xff]  ;;  %v68_v6 = vld [vmem:[#allocation5 + $0xe0] sm:$0xff]  ;;  %v67_v8 = vld [vmem:[#allocation5 + $0xd8] sm:$0xff]  ;;  %s240_s21 = scalar_lea.vmem %s151_s1, 128  ;;  %p245_p11 = scmp.lt.s32.totalorder %s151_s1, %s151_s1 }
  0x1d   :  { %162 = vmatprep.subr.mxu0 %v70_v2  ;;  %v52_v7 = vld [vmem:[#allocation5 + $0x60] sm:$0xff]  ;;  %v51_v9 = vld [vmem:[#allocation5 + $0x58] sm:$0xff]  ;;  %v66_v10 = vld [vmem:[#allocation5 + $0xd0] sm:$0xff]  ;;  %p241_p10 = scmp.ne.s32.totalorder %s151_s1, %s240_s21  ;;  %p246_p12 = scmp.lt.s32.totalorder %s240_s21, %s240_s21 }
  0x1e   :  { %163 = vmatpush3.msra.mxu0 %v54_v3  ;;  %v50_v11 = vld [vmem:[#allocation5 + $0x50] sm:$0xff]  ;;  %v65_v12 = vld [vmem:[#allocation5 + $0xc8] sm:$0xff]  ;;  %v39_v13 = vld [vmem:[#allocation2 + $0x8] sm:$0xff] }
  0x1f   :  { %164 = vmatprep.subr.mxu0 %v69_v4  ;;  %v49_v14 = vld [vmem:[#allocation5 + $0x48] sm:$0xff]  ;;  %136 = vmatprep.mubr.f32.mxu0 %v39_v13  ;;  %v64_v15 = vld [vmem:[#allocation5 + $0xc0] sm:$0xff]  ;;  %v63_v17 = vld [vmem:[#allocation5 + $0xb8] sm:$0xff]  ;;  %p247_p13 = por %p246_p12, %p245_p11 }
  0x20   :  { %165 = vmatpush3.msra.mxu0 %v53_v5  ;;  %v48_v16 = vld [vmem:[#allocation5 + $0x40] sm:$0xff]  ;;  %v47_v18 = vld [vmem:[#allocation5 + $0x38] sm:$0xff]  ;;  %v62_v19 = vld [vmem:[#allocation5 + $0xb0] sm:$0xff] }
  0x21   :  { %166 = vmatprep.subr.mxu0 %v68_v6  ;;  %v46_v20 = vld [vmem:[#allocation5 + $0x30] sm:$0xff]  ;;  %v61_v21 = vld [vmem:[#allocation5 + $0xa8] sm:$0xff]  ;;  %v60_v23 = vld [vmem:[#allocation5 + $0xa0] sm:$0xff]  ;;  %p248_p0 = pnand %p247_p13, %p241_p10 }
  0x22   :  { %167 = vmatpush3.msra.mxu0 %v52_v7  ;;  %v45_v22 = vld [vmem:[#allocation5 + $0x28] sm:$0xff]  ;;  %v44_v24 = vld [vmem:[#allocation5 + $0x20] sm:$0xff]  ;;  %v59_v25 = vld [vmem:[#allocation5 + $0x98] sm:$0xff] }
  0x23   :  { %168 = vmatprep.subr.mxu0 %v67_v8  ;;  %v43_v26 = vld [vmem:[#allocation5 + $0x18] sm:$0xff]  ;;  %v58_v27 = vld [vmem:[#allocation5 + $0x90] sm:$0xff]  ;;  %v57_v29 = vld [vmem:[#allocation5 + $0x88] sm:$0xff] }
  0x24   :  { %169 = vmatpush3.msra.mxu0 %v51_v9  ;;  %v42_v28 = vld [vmem:[#allocation5 + $0x10] sm:$0xff]  ;;  %v41_v30 = vld [vmem:[#allocation5 + $0x8] sm:$0xff]  ;;  %v56_v31 = vld [vmem:[#allocation5 + $0x80] sm:$0xff] }
  0x25   :  { %170 = vmatprep.subr.mxu0 %v66_v10  ;;  %v40_v32 = vld [vmem:[#allocation5] sm:$0xff]  ;;  %v38_v33 = vld [vmem:[#allocation2] sm:$0xff] }
  0x26   :  { %171 = vmatpush3.msra.mxu0 %v50_v11 }
  0x27   :  { %172 = vmatprep.subr.mxu0 %v65_v12 }
  0x28   :  { %173 = vmatpush3.msra.mxu0 %v49_v14 }
  0x29   :  { %174 = vmatprep.subr.mxu0 %v64_v15 }
  0x2a   :  { %175 = vmatpush3.msra.mxu0 %v48_v16 }
  0x2b   :  { %176 = vmatprep.subr.mxu0 %v63_v17 }
  0x2c   :  { %177 = vmatpush3.msra.mxu0 %v47_v18 }
  0x2d   :  { %178 = vmatprep.subr.mxu0 %v62_v19 }
  0x2e   :  { %179 = vmatpush3.msra.mxu0 %v46_v20 }
  0x2f   :  { %180 = vmatprep.subr.mxu0 %v61_v21 }
  0x30   :  { %181 = vmatpush3.msra.mxu0 %v45_v22 }
  0x31   :  { %182 = vmatprep.subr.mxu0 %v60_v23 }
  0x32   :  { %183 = vmatpush3.msra.mxu0 %v44_v24 }
  0x33   :  { %184 = vmatprep.subr.mxu0 %v59_v25 }
  0x34   :  { %185 = vmatpush3.msra.mxu0 %v43_v26 }
  0x35   :  { %186 = vmatprep.subr.mxu0 %v58_v27 }
  0x36   :  { %187 = vmatpush3.msra.mxu0 %v42_v28 }
  0x37   :  { %188 = vmatprep.subr.mxu0 %v57_v29 }
  0x38   :  { %189 = vmatpush3.msra.mxu0 %v41_v30 }
  0x39   :  { %190 = vmatprep.subr.mxu0 %v56_v31 }
  0x3a   :  { %191 = vmatpush3.msra.mxu0 %v40_v32 }
  0x3b   :  { %137 = vmatmul.mubr.f32.vlgmr.msra.gmra.mxu0 %v38_v33 }
  0xfb   :  { %v192_v34 = vpop.f32.mrf.mxu0 }
  0xfd   :  { %v193_v35 = vpop.f32.mrf.mxu0 }
  0xfe   :  { %v194_v36 = vadd.f32 %v193_v35, %v192_v34 }
 0x100   :  { %v142_v37 = vmul.f32 25.0, %v194_v36 }
 0x102   :  { %143 = vst [vmem:[#allocation7] sm:$0xff] %v142_v37 }
 0x103   :  { %251 = shalt.err (!%p248_p0)
}
 0x104   :  { %153 = dma.vmem_to_hbm [thread:$0]  %s151_s1, 128, %s297_s2, [#allocation4]  }
 0x105   :  { %264 = dma.done.wait [#allocation4], 128  }
 0x106   :  { %265 = vsyncadd [#allocation4], 4294967168 }
 0x107   :  { %157 = vsyncpa [#allocation3], 1 }
 0x108   :  { %158 = vsyncpa [#allocation6], 1 }
 0x109   :  { %159 = vsyncpa [#allocation4], 1 }

</bundles_post_ra>
